<compile_context>
chip_gen: v7x
topology: tpu7x:2x2x1
jax: 0.10.0
libtpu: 0.0.40
codegen_flags: <defaults>
</compile_context>

<pallas_src>
import math

import jax
import jax.numpy as jnp
from jax.experimental import pallas as pl
from jax.experimental.pallas import tpu as pltpu

BN_EPS = 1e-5
_DENOM_CLAMP = 1e-30   # exp(-1/1e-30) == 0 in f32 -> exact bump value outside (-1, 1)


def _bump_kan_kernel(x_t_ref, scale_t_ref, trans_t_ref, ww_t_ref, o_ref, acc_ref):
    # x_t_ref:     (cI, B)   in_features chunk on sublanes, batch on lanes
    # scale_t_ref: (cI, tO)  transposed params -> out_features on the lane axis
    # trans_t_ref: (cI, tO)
    # ww_t_ref:    (cI, tO)
    # o_ref:       (B, tO)   resident across the in_features (k) axis
    # acc_ref:     (B, tO)   f32 VMEM scratch accumulator
    k = pl.program_id(1)

    @pl.when(k == 0)
    def _():
        acc_ref[...] = jnp.zeros_like(acc_ref)

    x_t = x_t_ref[...]                           # (cI, B)
    trans = trans_t_ref[...]                     # (cI, tO)
    ww = ww_t_ref[...]                           # (cI, tO)

    # Hoisted out of the 3-D broadcast: cI*tO reciprocals instead of cI*B*tO.
    inv_scale = 1.0 / scale_t_ref[...]           # (cI, tO)

    # (cI, B, tO) chunk: out_features lane-dense, batch on sublanes, in_features
    # chunk on the cheap outer axis (reduce below is plain vector adds, no XLU).
    xs = (x_t[:, :, None] - trans[:, None, :]) * inv_scale[:, None, :]
    # Single clamp replaces the compare/compare/and/select mask: for |xs| >= 1 the
    # exponent is <= -1e30 and exp underflows to exactly 0 (the intended bump value;
    # the literal torch expression would give inf * 0 = NaN just outside (-1, 1)).
    wavelet = jnp.exp(-1.0 / jnp.maximum(1.0 - xs * xs, _DENOM_CLAMP))

    # Weighted reduction over the in_features chunk -> (B, tO) partial sum.
    acc_ref[...] += jnp.sum(wavelet * ww[:, None, :], axis=0)

    @pl.when(k == pl.num_programs(1) - 1)
    def _():
        # BatchNorm1d, training mode: per-feature batch mean / biased variance.
        # B is whole in every block, so these statistics are exact.
        wout = acc_ref[...]
        mean = jnp.mean(wout, axis=0, keepdims=True)
        var = jnp.mean((wout - mean) ** 2, axis=0, keepdims=True)
        o_ref[...] = (wout - mean) * jax.lax.rsqrt(var + BN_EPS)


def _vmem_capacity_bytes():
    try:
        return int(pltpu.get_tpu_info().vmem_capacity_bytes)
    except Exception:
        return 64 * 1024 * 1024   # conservative fallback (v7x-sized VMEM)


def _step_bytes(B, c_i, t_o):
    """Honest per-grid-step VMEM accounting (f32)."""
    interm = 3 * c_i * B * t_o * 4        # xs / clamped denom / weighted product live copies
    params = 3 * 2 * c_i * t_o * 4        # double-buffered scale / translation / weights tiles
    x_blk = 2 * c_i * B * 4               # double-buffered x chunk
    out = 2 * B * t_o * 4                 # double-buffered output block
    acc = B * t_o * 4                     # f32 accumulator scratch
    return interm + params + x_blk + out + acc


def _pick_tiles(B, I, O, vmem_budget_bytes):
    """Pick (out_features tile, in_features chunk) that fit the VMEM budget."""
    # out_features tile: lane-aligned; when O >= 256 keep >= 2 parallel O-steps so
    # both TensorCores get work on v7x (neutral on single-core v5e/v6e).
    if O <= 128:
        t_o = O
    else:
        t_o = min((O // 128) * 128, 512)
        if O >= 256:
            t_o = min(t_o, max(128, ((O + 1) // 2) // 128 * 128))

    # in_features chunk: must divide I exactly (a padded chunk would pollute the
    # reduction with garbage) and be a multiple of 8 (sublane axis), or be I itself.
    candidates = [I] + [c for c in range(8, I, 8) if I % c == 0]
    candidates.sort(reverse=True)

    c_i = candidates[-1]
    for c in candidates:
        if _step_bytes(B, c, t_o) <= vmem_budget_bytes:
            c_i = c
            break

    # If even the smallest legal chunk overshoots, trade out_features width down.
    while t_o > 128 and _step_bytes(B, c_i, t_o) > vmem_budget_bytes:
        t_o -= 128

    return t_o, c_i


def bump_kan_forward(x, scale, translation, wavelet_weights):
    B, I = x.shape
    O = scale.shape[0]

    # XLA-side (cheap) transposes so every kernel block is lane-dense in out_features
    # and the in_features chunk sits on a sublane axis for both x and the parameters.
    x_t = x.T                        # (I, B)
    scale_t = scale.T                # (I, O)
    trans_t = translation.T          # (I, O)
    ww_t = wavelet_weights.T         # (I, O)

    cap = _vmem_capacity_bytes()     # generation-aware (64 MiB on v7x, 128 MiB v5e/v6e)
    budget = int(0.4 * cap)
    t_o, c_i = _pick_tiles(B, I, O, budget)

    n_o_tiles = pl.cdiv(O, t_o)
    n_i_chunks = pl.cdiv(I, c_i)     # exact: c_i divides I (or equals it)

    est = _step_bytes(B, c_i, t_o)
    vmem_limit = int(min(int(0.9 * cap), max(2 * est, 32 * 1024 * 1024)))

    cost = pl.CostEstimate(
        flops=8 * B * I * O,
        transcendentals=2 * B * I * O,        # exp + divide per element
        bytes_accessed=4 * (B * I + 3 * I * O + B * O),
    )

    return pl.pallas_call(
        _bump_kan_kernel,
        out_shape=jax.ShapeDtypeStruct((B, O), jnp.float32),
        grid=(n_o_tiles, n_i_chunks),
        in_specs=[
            # x chunk changes along k -> double buffering is useful here.
            pl.BlockSpec((c_i, B), lambda j, k: (k, 0)),
            pl.BlockSpec((c_i, t_o), lambda j, k: (k, j)),
            pl.BlockSpec((c_i, t_o), lambda j, k: (k, j)),
            pl.BlockSpec((c_i, t_o), lambda j, k: (k, j)),
        ],
        out_specs=pl.BlockSpec((B, t_o), lambda j, k: (0, j)),
        scratch_shapes=[pltpu.VMEM((B, t_o), jnp.float32)],
        compiler_params=pltpu.CompilerParams(
            # O tiles are independent (BatchNorm is per output feature): parallel.
            # The in_features chunk axis is a reduction: arbitrary, last.
            dimension_semantics=("parallel", "arbitrary"),
            vmem_limit_bytes=vmem_limit,
        ),
        cost_estimate=cost,
    )(x_t, scale_t, trans_t, ww_t)


def bump_kan_reference(x, scale, translation, wavelet_weights):
    # Pure-JAX reference in the PyTorch (B, O, I) layout, with the NaN-safe guard
    # (the mathematically intended bump is 0 outside (-1, 1)).
    xs = (x[:, None, :] - translation[None]) / scale[None]
    inside = jnp.logical_and(xs > -1.0, xs < 1.0)
    denom = jnp.where(inside, 1.0 - xs * xs, 1.0)
    wavelet = jnp.where(inside, jnp.exp(-1.0 / denom), 0.0)
    wout = jnp.sum(wavelet * wavelet_weights[None], axis=2)
    mean = jnp.mean(wout, axis=0, keepdims=True)
    var = jnp.mean((wout - mean) ** 2, axis=0, keepdims=True)
    return (wout - mean) * jax.lax.rsqrt(var + BN_EPS)


if __name__ == "__main__":
    B, IN_DIM, OUT_DIM = 8, 16, 32

    key = jax.random.PRNGKey(0)
    k_x, k_ww, k_w1 = jax.random.split(key, 3)

    # Module parameters (deterministic synthetic init matching __init__ shapes):
    #   scale = ones(O, I), translation = zeros(O, I)
    #   wavelet_weights, weight1: kaiming_uniform_(a=sqrt(5)) -> U(-1/sqrt(I), 1/sqrt(I))
    bound = 1.0 / math.sqrt(IN_DIM)
    scale = jnp.ones((OUT_DIM, IN_DIM), jnp.float32)
    translation = jnp.zeros((OUT_DIM, IN_DIM), jnp.float32)
    wavelet_weights = jax.random.uniform(
        k_ww, (OUT_DIM, IN_DIM), jnp.float32, minval=-bound, maxval=bound)
    weight1 = jax.random.uniform(  # dead code in the PyTorch forward; unused here
        k_w1, (OUT_DIM, IN_DIM), jnp.float32, minval=-bound, maxval=bound)

    x = jax.random.normal(k_x, (B, IN_DIM), jnp.float32)

    out = bump_kan_forward(x, scale, translation, wavelet_weights)
    out = jax.block_until_ready(out)

    ref = bump_kan_reference(x, scale, translation, wavelet_weights)
    assert out.shape == (B, OUT_DIM)
    assert bool(jnp.all(jnp.isfinite(out)))
    assert jnp.allclose(out, ref, atol=1e-4, rtol=1e-4)

    print("KERNEL_OK")
</pallas_src>

<mosaic_0001>
module attributes {stable_mosaic.version = 11 : i64} {
  func.func @_bump_kan_kernel(%arg0: i32, %arg1: i32, %arg2: memref<16x8xf32, #tpu.memory_space<vmem>>, %arg3: memref<16x32xf32, #tpu.memory_space<vmem>>, %arg4: memref<16x32xf32, #tpu.memory_space<vmem>>, %arg5: memref<16x32xf32, #tpu.memory_space<vmem>>, %arg6: memref<8x32xf32, #tpu.memory_space<vmem>>, %arg7: memref<8x32xf32, #tpu.memory_space<vmem>>) attributes {dimension_semantics = [#tpu.dimension_semantics<parallel>, #tpu.dimension_semantics<arbitrary>], iteration_bounds = array<i64: 1, 1>, scalar_prefetch = 0 : i64, scratch_operands = 1 : i64, tpu.core_type = #tpu.core_type<tc>, window_params = [{transform_indices = @transform_0, window_bounds = array<i64: 16, 8>}, {transform_indices = @transform_1, window_bounds = array<i64: 16, 32>}, {transform_indices = @transform_2, window_bounds = array<i64: 16, 32>}, {transform_indices = @transform_3, window_bounds = array<i64: 16, 32>}, {transform_indices = @transform_4, window_bounds = array<i64: 8, 32>}]} {
    %c0_i32 = arith.constant 0 : i32
    %0 = arith.cmpi eq, %arg1, %c0_i32 : i32
    %1 = arith.extui %0 : i1 to i32
    %c0_i32_0 = arith.constant 0 : i32
    %2 = arith.cmpi ne, %1, %c0_i32_0 : i32
    scf.if %2 {
      %cst_18 = arith.constant 0.000000e+00 : f32
      %35 = vector.broadcast %cst_18 : f32 to vector<8x32xf32>
      %c0_19 = arith.constant 0 : index
      %c0_20 = arith.constant 0 : index
      %36 = vector.load %arg7[%c0_19, %c0_20] : memref<8x32xf32, #tpu.memory_space<vmem>>, vector<8x32xf32>
      tpu.vector_store %arg7[%c0_19, %c0_20], %35 {strides = array<i32>} : memref<8x32xf32, #tpu.memory_space<vmem>>, vector<8x32xf32>,
    } else {
    }
    %c0 = arith.constant 0 : index
    %c0_1 = arith.constant 0 : index
    %3 = vector.load %arg2[%c0, %c0_1] : memref<16x8xf32, #tpu.memory_space<vmem>>, vector<16x8xf32>
    %c0_2 = arith.constant 0 : index
    %c0_3 = arith.constant 0 : index
    %4 = vector.load %arg4[%c0_2, %c0_3] : memref<16x32xf32, #tpu.memory_space<vmem>>, vector<16x32xf32>
    %c0_4 = arith.constant 0 : index
    %c0_5 = arith.constant 0 : index
    %5 = vector.load %arg5[%c0_4, %c0_5] : memref<16x32xf32, #tpu.memory_space<vmem>>, vector<16x32xf32>
    %c0_6 = arith.constant 0 : index
    %c0_7 = arith.constant 0 : index
    %6 = vector.load %arg3[%c0_6, %c0_7] : memref<16x32xf32, #tpu.memory_space<vmem>>, vector<16x32xf32>
    %cst = arith.constant 1.000000e+00 : f32
    %7 = vector.broadcast %cst : f32 to vector<16x32xf32>
    %8 = arith.divf %7, %6 : vector<16x32xf32>
    %9 = vector.shape_cast %3 : vector<16x8xf32> to vector<16x8x1xf32>
    %10 = vector.shape_cast %4 : vector<16x32xf32> to vector<16x1x32xf32>
    %11 = vector.broadcast %9 : vector<16x8x1xf32> to vector<16x8x32xf32>
    %12 = vector.broadcast %10 : vector<16x1x32xf32> to vector<16x8x32xf32>
    %13 = arith.subf %11, %12 : vector<16x8x32xf32>
    %14 = vector.shape_cast %8 : vector<16x32xf32> to vector<16x1x32xf32>
    %15 = vector.broadcast %14 : vector<16x1x32xf32> to vector<16x8x32xf32>
    %16 = arith.mulf %13, %15 : vector<16x8x32xf32>
    %17 = arith.mulf %16, %16 : vector<16x8x32xf32>
    %cst_8 = arith.constant 1.000000e+00 : f32
    %18 = vector.broadcast %cst_8 : f32 to vector<16x8x32xf32>
    %19 = arith.subf %18, %17 : vector<16x8x32xf32>
    %cst_9 = arith.constant 1.000000e-30 : f32
    %20 = vector.broadcast %cst_9 : f32 to vector<16x8x32xf32>
    %21 = arith.maximumf %19, %20 : vector<16x8x32xf32>
    %cst_10 = arith.constant -1.000000e+00 : f32
    %22 = vector.broadcast %cst_10 : f32 to vector<16x8x32xf32>
    %23 = arith.divf %22, %21 : vector<16x8x32xf32>
    %24 = math.exp %23 : vector<16x8x32xf32>
    %c0_11 = arith.constant 0 : index
    %c0_12 = arith.constant 0 : index
    %25 = vector.load %arg7[%c0_11, %c0_12] : memref<8x32xf32, #tpu.memory_space<vmem>>, vector<8x32xf32>
    %26 = vector.shape_cast %5 : vector<16x32xf32> to vector<16x1x32xf32>
    %27 = vector.broadcast %26 : vector<16x1x32xf32> to vector<16x8x32xf32>
    %28 = arith.mulf %24, %27 : vector<16x8x32xf32>
    %cst_13 = arith.constant dense<0.000000e+00> : vector<8x32xf32>
    %29 = vector.multi_reduction <add>, %28, %cst_13 [0] : vector<16x8x32xf32> to vector<8x32xf32>
    %30 = arith.addf %25, %29 : vector<8x32xf32>
    %c0_14 = arith.constant 0 : index
    %c0_15 = arith.constant 0 : index
    %31 = vector.load %arg7[%c0_14, %c0_15] : memref<8x32xf32, #tpu.memory_space<vmem>>, vector<8x32xf32>
    tpu.vector_store %arg7[%c0_14, %c0_15], %30 {strides = array<i32>} : memref<8x32xf32, #tpu.memory_space<vmem>>, vector<8x32xf32>,
    %c0_i32_16 = arith.constant 0 : i32
    %32 = arith.cmpi eq, %arg1, %c0_i32_16 : i32
    %33 = arith.extui %32 : i1 to i32
    %c0_i32_17 = arith.constant 0 : i32
    %34 = arith.cmpi ne, %33, %c0_i32_17 : i32
    scf.if %34 {
      %c0_18 = arith.constant 0 : index
      %c0_19 = arith.constant 0 : index
      %35 = vector.load %arg7[%c0_18, %c0_19] : memref<8x32xf32, #tpu.memory_space<vmem>>, vector<8x32xf32>
      %cst_20 = arith.constant dense<0.000000e+00> : vector<32xf32>
      %36 = vector.multi_reduction <add>, %35, %cst_20 [0] : vector<8x32xf32> to vector<32xf32>
      %37 = vector.shape_cast %36 : vector<32xf32> to vector<1x32xf32>
      %cst_21 = arith.constant 8.000000e+00 : f32
      %38 = vector.broadcast %cst_21 : f32 to vector<1x32xf32>
      %39 = arith.divf %37, %38 : vector<1x32xf32>
      %40 = vector.broadcast %39 : vector<1x32xf32> to vector<8x32xf32>
      %41 = arith.subf %35, %40 : vector<8x32xf32>
      %42 = arith.mulf %41, %41 : vector<8x32xf32>
      %cst_22 = arith.constant dense<0.000000e+00> : vector<32xf32>
      %43 = vector.multi_reduction <add>, %42, %cst_22 [0] : vector<8x32xf32> to vector<32xf32>
      %44 = vector.shape_cast %43 : vector<32xf32> to vector<1x32xf32>
      %cst_23 = arith.constant 8.000000e+00 : f32
      %45 = vector.broadcast %cst_23 : f32 to vector<1x32xf32>
      %46 = arith.divf %44, %45 : vector<1x32xf32>
      %47 = vector.broadcast %39 : vector<1x32xf32> to vector<8x32xf32>
      %48 = arith.subf %35, %47 : vector<8x32xf32>
      %cst_24 = arith.constant 9.99999974E-6 : f32
      %49 = vector.broadcast %cst_24 : f32 to vector<1x32xf32>
      %50 = arith.addf %46, %49 : vector<1x32xf32>
      %51 = math.rsqrt %50 : vector<1x32xf32>
      %52 = vector.broadcast %51 : vector<1x32xf32> to vector<8x32xf32>
      %53 = arith.mulf %48, %52 : vector<8x32xf32>
      %c0_25 = arith.constant 0 : index
      %c0_26 = arith.constant 0 : index
      %54 = vector.load %arg6[%c0_25, %c0_26] : memref<8x32xf32, #tpu.memory_space<vmem>>, vector<8x32xf32>
      tpu.vector_store %arg6[%c0_25, %c0_26], %53 {strides = array<i32>} : memref<8x32xf32, #tpu.memory_space<vmem>>, vector<8x32xf32>,
    } else {
    }
    return
  }
  func.func @transform_0(%arg0: i32, %arg1: i32) -> (i32, i32) {
    %c0_i32 = arith.constant 0 : i32
    %c0_i32_0 = arith.constant 0 : i32
    return %arg1, %c0_i32 : i32, i32
  }
  func.func @transform_1(%arg0: i32, %arg1: i32) -> (i32, i32) {
    %c0_i32 = arith.constant 0 : i32
    return %arg1, %arg0 : i32, i32
  }
  func.func @transform_2(%arg0: i32, %arg1: i32) -> (i32, i32) {
    %c0_i32 = arith.constant 0 : i32
    return %arg1, %arg0 : i32, i32
  }
  func.func @transform_3(%arg0: i32, %arg1: i32) -> (i32, i32) {
    %c0_i32 = arith.constant 0 : i32
    return %arg1, %arg0 : i32, i32
  }
  func.func @transform_4(%arg0: i32, %arg1: i32) -> (i32, i32) {
    %c0_i32 = arith.constant 0 : i32
    %c0_i32_0 = arith.constant 0 : i32
    return %c0_i32, %arg0 : i32, i32
  }
}

</mosaic_0001>

<bundles_post_ra>
// kernel: tpu_custom_call.1
= control target key start
LH: loop header
LB: loop body
LE: loop exit
PB: predicated region body
PF: predicated region fallthrough
CT: control target
= control target key end

     0   :  { %9 = vsyncpa [#allocation4], 0  ;;  %s1559_s0 = inlined_call_operand.vmem [shape: f32[16,8], index: 0, kind: input, shape index: {}]   ;;  %s1560_s1 = inlined_call_operand.vmem [shape: f32[16,32], index: 1, kind: input, shape index: {}]   ;;  %s1561_s2 = inlined_call_operand.hbm [shape: f32[16,32], index: 2, kind: input, shape index: {}]   ;;  %s1562_s3 = inlined_call_operand.vmem [shape: f32[16,32], index: 3, kind: input, shape index: {}]   ;;  %s1563_s4 = inlined_call_operand.hbm [shape: f32[8,32], index: 4, kind: output, shape index: {}]  }
   0x1   :  { %10 = vsyncpa [#allocation5], 0  ;;  %s1067_s15 = smov [#allocation3]   ;;  %s1019_s19 = scalar_lea.hbm %s1561_s2, 256 }
   0x2   :  { %s20_s16 = sshll.u32 %s1067_s15, 4  ;;  %p1020_p0 = scmp.ne.s32.totalorder %s1561_s2, %s1019_s19  ;;  %s21_s16 = int_to_ptr.vmem [resolvable:$true] %s20_s16 }
   0x3   :  { %p1023_p1 = scmp.lt.u32.totalorder %s1019_s19, %s1561_s2 }
   0x5   :  { %p1025_p2 = pnand %p1023_p1, %p1020_p0 }
   0x7   :  { %1028 = shalt.err (!%p1025_p2)
}
   0x8   :  { %s1029_s24 = scalar_lea.vmem %s21_s16, 256  ;;  %p1034_p4 = scmp.lt.s32.totalorder %s21_s16, %s21_s16 }
   0x9   :  { %p1030_p3 = scmp.ne.s32.totalorder %s21_s16, %s1029_s24  ;;  %p1035_p5 = scmp.lt.s32.totalorder %s1029_s24, %s1029_s24 }
   0xb   :  { %p1036_p6 = por %p1035_p5, %p1034_p4 }
   0xd   :  { %p1037_p7 = pnand %p1036_p6, %p1030_p3 }
   0xf   :  { %1040 = shalt.err (!%p1037_p7)
}
  0x10   :  { %s1068_s25 = smov 128   ;;  %s1069_s26 = smov 8  }
  0x11   :  { %26 = dma.hbm_to_vmem [thread:$0]  %s1561_s2, 256, %s21_s16, [#allocation4], %s1068_s25, %s1068_s25, %s1069_s26  }
  0x12   :  { %1063 = dma.done.wait [#allocation4], 256  }
  0x13   :  { %1064 = vsyncadd [#allocation4], 4294967040  ;;  %v50_v0 = vlaneseq  ;;  %v1070_v1 = vmov 1966171168   ;;  %v38_v13 = vld [vmem:[%s1559_s0] sm:$0xff]  ;;  %v1118_v14 = vld [vmem:[%s1559_s0 + $0x8] sm:$0xff] }
  0x14   :  { %v166_v2 = vunpack.c.l.s4 %v1070_v1  ;;  %v44_v17 = vld [vmem:[%s1560_s1] sm:$0xff]  ;;  %v40_v23 = vld [vmem:[#allocation3] sm:$0xff]  ;;  %v45_v29 = vld [vmem:[%s1560_s1 + $0x8] sm:$0xff]  ;;  %vm36_vm0 = vcmask 261120  }
  0x15   :  { %v51_v3 = vshrl.u32 %v50_v0, 7  ;;  %v1129_v24 = vld [vmem:[%s1562_s3] sm:$0xff]  ;;  %949 = vrcp.f32 %v44_v17  ;;  %v164_v37 = vcombine.high %v40_v23, %v40_v23 }
  0x16   :  { %v167_v6 = vunpack.c.0.s8 %v166_v2  ;;  %v41_v28 = vld [vmem:[#allocation3 + $0x8] sm:$0xff]  ;;  %951 = vrcp.f32 %v45_v29 }
  0x17   :  { %v1110_v4 = vsub.s32 0, %v51_v3  ;;  %v66_v5 = vsub.s32 2, %v51_v3  ;;  %v59_v7 = vsub.s32 1, %v51_v3  ;;  %v73_v8 = vsub.s32 3, %v51_v3 }
  0x18   :  { %v80_v9 = vsub.s32 4, %v51_v3  ;;  %v87_v10 = vsub.s32 5, %v51_v3  ;;  %v94_v11 = vsub.s32 6, %v51_v3  ;;  %v101_v12 = vsub.s32 7, %v51_v3 }
  0x19   :  { %v53_v15 = vrot.slane %v38_v13, %v1110_v4  ;;  %v67_v16 = vrot.slane %v38_v13, %v66_v5  ;;  %v1124_v18 = vsub.s32 %v167_v6, %v51_v3  ;;  %v60_v19 = vrot.slane %v38_v13, %v59_v7 }
  0x1a   :  { %v74_v20 = vrot.slane %v38_v13, %v73_v8  ;;  %v81_v21 = vrot.slane %v38_v13, %v80_v9  ;;  %v88_v22 = vrot.slane %v38_v13, %v87_v10  ;;  %v95_v25 = vrot.slane %v38_v13, %v94_v11 }
  0x1b   :  { %55 = vbcast.lane.b32.xlu0 %v53_v15, 256  ;;  %69 = vbcast.lane.b32.xlu1 %v67_v16, 256  ;;  %v102_v26 = vrot.slane %v38_v13, %v101_v12  ;;  %v109_v27 = vrot.slane %v1118_v14, %v1110_v4  ;;  %v1137_v30 = vrot.slane %v1118_v14, %v59_v7 }
  0x1c   :  { %v1140_v31 = vrot.slane %v1118_v14, %v66_v5  ;;  %v1143_v32 = vrot.slane %v1118_v14, %v73_v8  ;;  %v1146_v33 = vrot.slane %v1118_v14, %v80_v9  ;;  %v1149_v34 = vrot.slane %v1118_v14, %v87_v10 }
  0x1d   :  { %v171_v35 = vrot.slane %v40_v23, %v1124_v18  ;;  %v1154_v36 = vrot.slane %v1129_v24, %v1124_v18  ;;  %v1157_v38 = vrot.slane %v1118_v14, %v94_v11  ;;  %v1160_v39 = vrot.slane %v1118_v14, %v101_v12 }
  0x1e   :  { %v220_v40 = vrot.slane %v41_v28, %v1124_v18  ;;  %v178_v44 = vrot.slane %v164_v37, %v1124_v18  ;;  %v213_v47 = vcombine.high %v41_v28, %v41_v28 }
  0x1f   :  { %62 = vbcast.lane.b32.xlu0 %v60_v19, 256  ;;  %76 = vbcast.lane.b32.xlu1 %v74_v20, 256  ;;  %v1164_v41 = vrot.slane %v171_v35, %v1124_v18  ;;  %v1168_v42 = vrot.slane %v1154_v36, %v1124_v18  ;;  %v179_v43 = vcombine.high %v171_v35, %v171_v35  ;;  %v950_v63 = vpop.eup %949 }
  0x20   :  { %v1172_v45 = vrot.slane %v220_v40, %v1124_v18  ;;  %v228_v46 = vcombine.high %v220_v40, %v220_v40  ;;  %v1184_v52 = vrot.slane %v178_v44, %v1124_v18  ;;  %v180_v53 = vcombine.high %v178_v44, %v178_v44  ;;  %v952_v12 = vpop.eup %951 }
  0x21   :  { %v265_v48 = vrot.slane %v1164_v41, %v1110_v4  ;;  %v209_v50 = vcombine.high %v1164_v41, %v1164_v41  ;;  %v1181_v51 = vrot.slane %v179_v43, %v1124_v18  ;;  %v227_v3 = vrot.slane %v213_v47, %v1124_v18 }
  0x22   :  { %v1189_v55 = vrot.slane %v228_v46, %v1124_v18  ;;  %v1201_v60 = vrot.slane %v180_v53, %v1124_v18  ;;  %v210_v61 = vcombine.high %v1184_v52, %v1184_v52  ;;  %v258_v1 = vcombine.high %v1172_v45, %v1172_v45 }
  0x23   :  { %83 = vbcast.lane.b32.xlu0 %v81_v21, 256  ;;  %90 = vbcast.lane.b32.xlu1 %v88_v22, 256  ;;  %v1192_v56 = vrot.slane %v209_v50, %v1110_v4  ;;  %v269_v57 = vrot.slane %v1181_v51, %v1110_v4  ;;  %v211_v58 = vcombine.high %v1181_v51, %v1181_v51 }
  0x24   :  { %v260_v2 = vcombine.high %v1189_v55, %v1189_v55  ;;  %v367_v5 = vrot.slane %v950_v63, %v1124_v18  ;;  %v360_v6 = vcombine.high %v950_v63, %v950_v63  ;;  %v1219_v8 = vrot.slane %v210_v61, %v1110_v4 }
  0x25   :  { %v1208_v0 = vrot.slane %v211_v58, %v1110_v4  ;;  %v212_v9 = vcombine.high %v1201_v60, %v1201_v60  ;;  %v1224_v10 = vrot.slane %v258_v1, %v1110_v4  ;;  %v1234_v17 = vrot.slane %v227_v3, %v1124_v18 }
  0x26   :  { %v1227_v11 = vrot.slane %v260_v2, %v1110_v4  ;;  %v1230_v13 = vrot.slane %v367_v5, %v1124_v18  ;;  %v375_v15 = vcombine.high %v367_v5, %v367_v5  ;;  %v374_v16 = vrot.slane %v360_v6, %v1124_v18 }
  0x27   :  { %97 = vbcast.lane.b32.xlu0 %v95_v25, 256  ;;  %104 = vbcast.lane.b32.xlu1 %v102_v26, 256  ;;  %v1237_v19 = vrot.slane %v212_v9, %v1110_v4  ;;  %v416_v20 = vrot.slane %v952_v12, %v1124_v18  ;;  %v409_v21 = vcombine.high %v952_v12, %v952_v12 }
  0x28   :  { %v229_v22 = vcombine.high %v227_v3, %v227_v3  ;;  %v461_v23 = vrot.slane %v1230_v13, %v1110_v4  ;;  %v405_v25 = vcombine.high %v1230_v13, %v1230_v13  ;;  %v1245_v26 = vrot.slane %v375_v15, %v1124_v18 }
  0x29   :  { %v1248_v28 = vrot.slane %v374_v16, %v1124_v18  ;;  %v376_v29 = vcombine.high %v374_v16, %v374_v16  ;;  %v1255_v35 = vrot.slane %v416_v20, %v1124_v18  ;;  %v424_v37 = vcombine.high %v416_v20, %v416_v20 }
  0x2a   :  { %v1258_v40 = vrot.slane %v405_v25, %v1110_v4  ;;  %v407_v44 = vcombine.high %v1245_v26, %v1245_v26  ;;  %v423_v61 = vrot.slane %v409_v21, %v1124_v18  ;;  %v684_v3 = vcombine.high %v1154_v36, %v1154_v36 }
  0x2b   :  { %111 = vbcast.lane.b32.xlu0 %v109_v27, 256  ;;  %118 = vbcast.lane.b32.xlu1 %v1137_v30, 256  ;;  %v1267_v27 = vrot.slane %v376_v29, %v1124_v18  ;;  %v406_v30 = vcombine.high %v1248_v28, %v1248_v28  ;;  %v1274_v47 = vrot.slane %v424_v37, %v1124_v18 }
  0x2c   :  { %v1277_v50 = vrot.slane %v407_v44, %v1110_v4  ;;  %v454_v53 = vcombine.high %v1255_v35, %v1255_v35  ;;  %v1306_v9 = vrot.slane %v423_v61, %v1124_v18  ;;  %v1309_v12 = vrot.slane %v229_v22, %v1124_v18 }
  0x2d   :  { %v1289_v1 = vrot.slane %v406_v30, %v1110_v4  ;;  %v408_v2 = vcombine.high %v1267_v27, %v1267_v27  ;;  %v425_v15 = vcombine.high %v423_v61, %v423_v61  ;;  %v714_v36 = vcombine.high %v1168_v42, %v1168_v42 }
  0x2e   :  { %v1298_v6 = vrot.slane %v454_v53, %v1110_v4  ;;  %v1314_v16 = vrot.slane %v684_v3, %v1124_v18  ;;  %v259_v21 = vcombine.high %v1234_v17, %v1234_v17  ;;  %v455_v53 = vcombine.high %v1306_v9, %v1306_v9 }
  0x2f   :  { %125 = vbcast.lane.b32.xlu0 %v1140_v31, 256  ;;  %132 = vbcast.lane.b32.xlu1 %v1143_v32, 256  ;;  %v456_v31 = vcombine.high %v1274_v47, %v1274_v47  ;;  %v1303_v32 = vrot.slane %v408_v2, %v1110_v4  ;;  %v1328_v29 = vrot.slane %v425_v15, %v1124_v18 }
  0x30   :  { %v1331_v37 = vrot.slane %v714_v36, %v1110_v4  ;;  %v261_v61 = vcombine.high %v1309_v12, %v1309_v12  ;;  %v716_v3 = vcombine.high %v1314_v16, %v1314_v16  ;;  %v1565_v51 = vrot.slane %v1184_v52, %v1110_v4 }
  0x31   :  { %v1317_v20 = vrot.slane %v456_v31, %v1110_v4  ;;  %v457_v2 = vcombine.high %v1328_v29, %v1328_v29  ;;  %v1354_v31 = vrot.slane %v455_v53, %v1110_v4 }
  0x32   :  { %v1357_v15 = vrot.slane %v261_v61, %v1110_v4 }
  0x33   :  { %139 = vbcast.lane.b32.xlu0 %v1146_v33, 256  ;;  %146 = vbcast.lane.b32.xlu1 %v1149_v34, 256  ;;  %v669_v33 = vcombine.high %v1129_v24, %v1129_v24  ;;  %v1338_v34 = vrot.slane %v259_v21, %v1110_v4  ;;  %v1360_v36 = vrot.slane %v457_v2, %v1110_v4  ;;  %v43_v2 = vld [vmem:[%s1562_s3 + $0x8] sm:$0xff]  ;;  %s1072_s3 = smov [#allocation6]  }
  0x34   :  { %v1363_v21 = vrot.slane %v716_v3, %v1110_v4  ;;  %v718_v58 = vcombine.high %v43_v2, %v43_v2  ;;  %s930_s12 = sshll.u32 %s1072_s3, 4  ;;  %s931_s12 = int_to_ptr.vmem [resolvable:$true] %s930_s12 }
  0x35   :  { %v683_v24 = vrot.slane %v669_v33, %v1124_v18  ;;  %s1041_s13 = scalar_lea.vmem %s931_s12, 128  ;;  %p1046_p9 = scmp.lt.s32.totalorder %s931_s12, %s931_s12 }
  0x36   :  { %p1042_p8 = scmp.ne.s32.totalorder %s931_s12, %s1041_s13  ;;  %p1047_p10 = scmp.lt.s32.totalorder %s1041_s13, %s1041_s13 }
  0x37   :  { %153 = vbcast.lane.b32.xlu0 %v1157_v38, 256  ;;  %160 = vbcast.lane.b32.xlu1 %v1160_v39, 256  ;;  %v1366_v44 = vrot.slane %v683_v24, %v1124_v18  ;;  %v685_v33 = vcombine.high %v683_v24, %v683_v24  ;;  %v725_v38 = vrot.slane %v43_v2, %v1124_v18 }
  0x38   :  { %p1048_p11 = por %p1047_p10, %p1046_p9 }
  0x39   :  { %v1371_v39 = vrot.slane %v685_v33, %v1124_v18  ;;  %v715_v61 = vcombine.high %v1366_v44, %v1366_v44  ;;  %v1390_v53 = vrot.slane %v725_v38, %v1124_v18  ;;  %v733_v49 = vcombine.high %v725_v38, %v725_v38 }
  0x3a   :  { %v732_v38 = vrot.slane %v718_v58, %v1124_v18  ;;  %p1049_p12 = pnand %p1048_p11, %p1042_p8 }
  0x3b   :  { %v1381_v3 = vrot.slane %v715_v61, %v1110_v4  ;;  %v717_v24 = vcombine.high %v1371_v39, %v1371_v39  ;;  %v1395_v25 = vrot.slane %v733_v49, %v1124_v18  ;;  %v763_v22 = vcombine.high %v1390_v53, %v1390_v53 }
  0x3c   :  { %v1411_v49 = vrot.slane %v732_v38, %v1124_v18  ;;  %v734_v46 = vcombine.high %v732_v38, %v732_v38  ;;  %v1071_v38 = vmov 0.0  }
  0x3d   :  { %v1387_v33 = vrot.slane %v717_v24, %v1110_v4  ;;  %v1402_v24 = vrot.slane %v763_v22, %v1110_v4  ;;  %v765_v5 = vcombine.high %v1395_v25, %v1395_v25  ;;  %37 = vst.msk [vmem:[#allocation2] sm:$0xff] %vm36_vm0, %v1071_v38 }
  0x3e   :  { %v1416_v2 = vrot.slane %v734_v46, %v1124_v18  ;;  %v764_v62 = vcombine.high %v1411_v49, %v1411_v49 }
  0x3f   :  { %v1408_v30 = vrot.slane %v765_v5, %v1110_v4 }
  0x40   :  { %v1423_v58 = vrot.slane %v764_v62, %v1110_v4  ;;  %v766_v5 = vcombine.high %v1416_v2, %v1416_v2 }
  0x42   :  { %v1429_v61 = vrot.slane %v766_v5, %v1110_v4 }
  0x8d   :  { %v56_v18 = vpop.permute.xlu0 %55  ;;  %v70_v46 = vpop.permute.xlu1 %69 }
  0x8e   :  { %v342_v22 = vsub.f32 %v56_v18, %v265_v48  ;;  %v344_v54 = vsub.f32 %v70_v46, %v1192_v56  ;;  %v1564_v56 = vrot.slane %v1245_v26, %v1110_v4 }
  0x90   :  { %v538_v62 = vmul.f32 %v461_v23, %v342_v22  ;;  %v540_v63 = vmul.f32 %v1258_v40, %v344_v54 }
  0x91   :  { %v63_v14 = vpop.permute.xlu0 %62  ;;  %v77_v7 = vpop.permute.xlu1 %76 }
  0x92   :  { %v554_v38 = vmul.f32 %v538_v62, %v538_v62  ;;  %v556_v59 = vmul.f32 %v540_v63, %v540_v63  ;;  %v343_v5 = vsub.f32 %v63_v14, %v269_v57  ;;  %v345_v43 = vsub.f32 %v77_v7, %v1208_v0 }
  0x93   :  { %v1566_v0 = vrot.slane %v1201_v60, %v1110_v4 }
  0x94   :  { %v570_v41 = vsub.f32 1.0, %v554_v38  ;;  %v572_v48 = vsub.f32 1.0, %v556_v59  ;;  %v539_v18 = vmul.f32 %v1564_v56, %v343_v5  ;;  %v541_v13 = vmul.f32 %v1277_v50, %v345_v43 }
  0x95   :  { %v84_v23 = vpop.permute.xlu0 %83  ;;  %v91_v54 = vpop.permute.xlu1 %90  ;;  %v1567_v43 = vrot.slane %v1248_v28, %v1110_v4  ;;  %v1568_v50 = vrot.slane %v1267_v27, %v1110_v4 }
  0x96   :  { %v586_v40 = vmax.f32 %v570_v41, 1e-30  ;;  %v588_v22 = vmax.f32 %v572_v48, 1e-30  ;;  %v555_v46 = vmul.f32 %v539_v18, %v539_v18  ;;  %v557_v63 = vmul.f32 %v541_v13, %v541_v13 }
  0x97   :  { %v346_v57 = vsub.f32 %v84_v23, %v1565_v51  ;;  %v347_v59 = vsub.f32 %v91_v54, %v1566_v0 }
  0x98   :  { %953 = vrcp.f32 %v586_v40  ;;  %v571_v7 = vsub.f32 1.0, %v555_v46  ;;  %v573_v26 = vsub.f32 1.0, %v557_v63  ;;  %v1569_v63 = vrot.slane %v1172_v45, %v1110_v4 }
  0x99   :  { %955 = vrcp.f32 %v588_v22  ;;  %v542_v14 = vmul.f32 %v1567_v43, %v346_v57  ;;  %v543_v62 = vmul.f32 %v1568_v50, %v347_v59  ;;  %v98_v38 = vpop.permute.xlu0 %97  ;;  %v105_v5 = vpop.permute.xlu1 %104 }
  0x9a   :  { %v587_v52 = vmax.f32 %v571_v7, 1e-30  ;;  %v589_v41 = vmax.f32 %v573_v26, 1e-30  ;;  %v348_v48 = vsub.f32 %v98_v38, %v1219_v8  ;;  %v349_v60 = vsub.f32 %v105_v5, %v1237_v19 }
  0x9b   :  { %v558_v56 = vmul.f32 %v542_v14, %v542_v14  ;;  %v559_v18 = vmul.f32 %v543_v62, %v543_v62  ;;  %v1570_v19 = vrot.slane %v1189_v55, %v1110_v4  ;;  %v1572_v26 = vrot.slane %v1274_v47, %v1110_v4 }
  0x9c   :  { %957 = vrcp.f32 %v587_v52  ;;  %v544_v13 = vmul.f32 %v1289_v1, %v348_v48  ;;  %v545_v28 = vmul.f32 %v1303_v32, %v349_v60  ;;  %v1571_v32 = vrot.slane %v1255_v35, %v1110_v4 }
  0x9d   :  { %959 = vrcp.f32 %v589_v41  ;;  %v574_v23 = vsub.f32 1.0, %v558_v56  ;;  %v575_v54 = vsub.f32 1.0, %v559_v18  ;;  %v112_v27 = vpop.permute.xlu0 %111  ;;  %v119_v40 = vpop.permute.xlu1 %118 }
  0x9e   :  { %v560_v22 = vmul.f32 %v544_v13, %v544_v13  ;;  %v561_v46 = vmul.f32 %v545_v28, %v545_v28  ;;  %v350_v8 = vsub.f32 %v112_v27, %v1569_v63  ;;  %v351_v51 = vsub.f32 %v119_v40, %v1570_v19 }
  0x9f   :  { %v590_v57 = vmax.f32 %v574_v23, 1e-30  ;;  %v591_v0 = vmax.f32 %v575_v54, 1e-30 }
  0xa0   :  { %v576_v1 = vsub.f32 1.0, %v560_v22  ;;  %v577_v59 = vsub.f32 1.0, %v561_v46  ;;  %v546_v7 = vmul.f32 %v1571_v32, %v350_v8  ;;  %v547_v43 = vmul.f32 %v1572_v26, %v351_v51 }
  0xa1   :  { %961 = vrcp.f32 %v590_v57  ;;  %v126_v14 = vpop.permute.xlu0 %125  ;;  %v133_v45 = vpop.permute.xlu1 %132 }
  0xa2   :  { %v954_v50 = vpop.eup %953  ;;  %963 = vrcp.f32 %v591_v0  ;;  %v592_v62 = vmax.f32 %v576_v1, 1e-30  ;;  %v593_v55 = vmax.f32 %v577_v59, 1e-30  ;;  %v562_v38 = vmul.f32 %v546_v7, %v546_v7 }
  0xa3   :  { %v956_v5 = vpop.eup %955  ;;  %v603_v52 = vmul.f32 -1.0, %v954_v50  ;;  %v563_v41 = vmul.f32 %v547_v43, %v547_v43  ;;  %v352_v48 = vsub.f32 %v126_v14, %v1224_v10  ;;  %v353_v35 = vsub.f32 %v133_v45, %v1227_v11 }
  0xa4   :  { %v607_v60 = vmul.f32 -1.0, %v956_v5  ;;  %965 = vrcp.f32 %v592_v62  ;;  %v578_v56 = vsub.f32 1.0, %v562_v38  ;;  %v1573_v10 = vrot.slane %v1234_v17, %v1110_v4 }
  0xa5   :  { %v634_v47 = vmul.f32 1.442695, %v603_v52  ;;  %967 = vrcp.f32 %v593_v55  ;;  %v579_v18 = vsub.f32 1.0, %v563_v41  ;;  %v548_v13 = vmul.f32 %v1298_v6, %v352_v48  ;;  %v140_v28 = vpop.permute.xlu0 %139  ;;  %v147_v23 = vpop.permute.xlu1 %146 }
  0xa6   :  { %v958_v54 = vpop.eup %957  ;;  %v638_v27 = vmul.f32 1.442695, %v607_v60  ;;  %v594_v40 = vmax.f32 %v578_v56, 1e-30  ;;  %v549_v22 = vmul.f32 %v1317_v20, %v353_v35  ;;  %v354_v46 = vsub.f32 %v140_v28, %v1573_v10 }
  0xa7   :  { %v960_v11 = vpop.eup %959  ;;  %969 = vpow2.f32 %v634_v47  ;;  %v605_v63 = vmul.f32 -1.0, %v958_v54  ;;  %v595_v8 = vmax.f32 %v579_v18, 1e-30  ;;  %v564_v19 = vmul.f32 %v548_v13, %v548_v13 }
  0xa8   :  { %971 = vpow2.f32 %v638_v27  ;;  %v609_v51 = vmul.f32 -1.0, %v960_v11  ;;  %v565_v57 = vmul.f32 %v549_v22, %v549_v22  ;;  %v1574_v6 = vrot.slane %v1306_v9, %v1110_v4 }
  0xa9   :  { %v636_v1 = vmul.f32 1.442695, %v605_v63  ;;  %973 = vrcp.f32 %v594_v40  ;;  %v580_v59 = vsub.f32 1.0, %v564_v19  ;;  %v1575_v20 = vrot.slane %v1309_v12, %v1110_v4  ;;  %v154_v32 = vpop.permute.xlu0 %153  ;;  %v161_v55 = vpop.permute.xlu1 %160 }
  0xaa   :  { %v550_v0 = vmul.f32 %v1574_v6, %v354_v46  ;;  %v640_v7 = vmul.f32 1.442695, %v609_v51  ;;  %975 = vrcp.f32 %v595_v8  ;;  %v581_v26 = vsub.f32 1.0, %v565_v57 }
  0xab   :  { %v355_v17 = vsub.f32 %v147_v23, %v1575_v20  ;;  %v962_v14 = vpop.eup %961  ;;  %977 = vpow2.f32 %v636_v1  ;;  %v596_v45 = vmax.f32 %v580_v59, 1e-30  ;;  %v1576_v50 = vrot.slane %v1328_v29, %v1110_v4 }
  0xac   :  { %v566_v43 = vmul.f32 %v550_v0, %v550_v0  ;;  %v356_v62 = vsub.f32 %v154_v32, %v1338_v34  ;;  %v964_v38 = vpop.eup %963  ;;  %979 = vpow2.f32 %v640_v7  ;;  %v611_v5 = vmul.f32 -1.0, %v962_v14 }
  0xad   :  { %v551_v9 = vmul.f32 %v1576_v50, %v355_v17  ;;  %v597_v12 = vmax.f32 %v581_v26, 1e-30  ;;  %v613_v41 = vmul.f32 -1.0, %v964_v38  ;;  %981 = vrcp.f32 %v596_v45 }
  0xae   :  { %v582_v52 = vsub.f32 1.0, %v566_v43  ;;  %v552_v35 = vmul.f32 %v1354_v31, %v356_v62  ;;  %v966_v60 = vpop.eup %965  ;;  %v642_v56 = vmul.f32 1.442695, %v611_v5  ;;  %v357_v29 = vsub.f32 %v161_v55, %v1357_v15 }
  0xaf   :  { %v567_v48 = vmul.f32 %v551_v9, %v551_v9  ;;  %983 = vrcp.f32 %v597_v12  ;;  %v968_v18 = vpop.eup %967  ;;  %v644_v13 = vmul.f32 1.442695, %v613_v41  ;;  %v615_v34 = vmul.f32 -1.0, %v966_v60 }
  0xb0   :  { %v598_v47 = vmax.f32 %v582_v52, 1e-30  ;;  %v568_v23 = vmul.f32 %v552_v35, %v552_v35  ;;  %985 = vpow2.f32 %v642_v56  ;;  %v617_v54 = vmul.f32 -1.0, %v968_v18 }
  0xb1   :  { %v583_v28 = vsub.f32 1.0, %v567_v48  ;;  %v553_v27 = vmul.f32 %v1360_v36, %v357_v29  ;;  %v970_v40 = vpop.eup %969  ;;  %987 = vpow2.f32 %v644_v13  ;;  %v646_v22 = vmul.f32 1.442695, %v615_v34 }
  0xb2   :  { %v584_v31 = vsub.f32 1.0, %v568_v23  ;;  %v972_v46 = vpop.eup %971  ;;  %v1577_v11 = vrot.slane %v1168_v42, %v1110_v4  ;;  %v648_v15 = vmul.f32 1.442695, %v617_v54  ;;  %989 = vrcp.f32 %v598_v47 }
  0xb3   :  { %v599_v10 = vmax.f32 %v583_v28, 1e-30  ;;  %v569_v8 = vmul.f32 %v553_v27, %v553_v27  ;;  %v974_v19 = vpop.eup %973  ;;  %v849_v51 = vmul.f32 %v972_v46, %v1331_v37  ;;  %991 = vpow2.f32 %v646_v22 }
  0xb4   :  { %v847_v63 = vmul.f32 %v970_v40, %v1577_v11  ;;  %v600_v57 = vmax.f32 %v584_v31, 1e-30  ;;  %v976_v6 = vpop.eup %975  ;;  %993 = vpow2.f32 %v648_v15  ;;  %v619_v36 = vmul.f32 -1.0, %v974_v19 }
  0xb5   :  { %v585_v0 = vsub.f32 1.0, %v569_v8  ;;  %v978_v1 = vpop.eup %977  ;;  %v621_v59 = vmul.f32 -1.0, %v976_v6  ;;  %995 = vrcp.f32 %v599_v10  ;;  %v1578_v42 = vrot.slane %v1314_v16, %v1110_v4 }
  0xb6   :  { %v980_v20 = vpop.eup %979  ;;  %v650_v32 = vmul.f32 1.442695, %v619_v36  ;;  %997 = vrcp.f32 %v600_v57  ;;  %v864_v45 = vsel %vm36_vm0, %v847_v63, 0.0  ;;  %v867_v16 = vsel %vm36_vm0, %v849_v51, 0.0 }
  0xb7   :  { %v848_v17 = vmul.f32 %v978_v1, %v1578_v42  ;;  %v601_v7 = vmax.f32 %v585_v0, 1e-30  ;;  %v982_v26 = vpop.eup %981  ;;  %v850_v37 = vmul.f32 %v980_v20, %v1363_v21  ;;  %v652_v43 = vmul.f32 1.442695, %v621_v59 }
  0xb8   :  { %999 = vpow2.f32 %v650_v32  ;;  %v623_v9 = vmul.f32 -1.0, %v982_v26  ;;  %v1579_v41 = vrot.slane %v1366_v44, %v1110_v4  ;;  %v1580_v56 = vrot.slane %v1371_v39, %v1110_v4 }
  0xb9   :  { %v984_v14 = vpop.eup %983  ;;  %v865_v50 = vsel %vm36_vm0, %v848_v17, 0.0  ;;  %1001 = vpow2.f32 %v652_v43  ;;  %v869_v5 = vsel %vm36_vm0, %v850_v37, 0.0  ;;  %v1582_v36 = vrot.slane %v1395_v25, %v1110_v4 }
  0xba   :  { %v866_v62 = vadd.f32 %v865_v50, %v864_v45  ;;  %v625_v55 = vmul.f32 -1.0, %v984_v14  ;;  %v986_v38 = vpop.eup %985  ;;  %v654_v12 = vmul.f32 1.442695, %v623_v9  ;;  %1003 = vrcp.f32 %v601_v7 }
  0xbb   :  { %v988_v52 = vpop.eup %987  ;;  %v851_v48 = vmul.f32 %v986_v38, %v1579_v41  ;;  %v1583_v9 = vrot.slane %v1411_v49, %v1110_v4 }
  0xbc   :  { %v868_v21 = vadd.f32 %v867_v16, %v866_v62  ;;  %v656_v35 = vmul.f32 1.442695, %v625_v55  ;;  %v990_v60 = vpop.eup %989  ;;  %v852_v47 = vmul.f32 %v988_v52, %v1580_v56  ;;  %1005 = vpow2.f32 %v654_v12  ;;  %v666_v56 = vld [vmem:[#allocation2] sm:$0xff] }
  0xbd   :  { %v992_v29 = vpop.eup %991  ;;  %v871_v13 = vsel %vm36_vm0, %v851_v48, 0.0  ;;  %v627_v34 = vmul.f32 -1.0, %v990_v60 }
  0xbe   :  { %v870_v18 = vadd.f32 %v869_v5, %v868_v21  ;;  %1007 = vpow2.f32 %v656_v35  ;;  %v994_v28 = vpop.eup %993  ;;  %v873_v23 = vsel %vm36_vm0, %v852_v47, 0.0  ;;  %v853_v54 = vmul.f32 %v992_v29, %v1381_v3 }
  0xbf   :  { %v996_v44 = vpop.eup %995  ;;  %v854_v40 = vmul.f32 %v994_v28, %v1387_v33  ;;  %v658_v22 = vmul.f32 1.442695, %v627_v34  ;;  %v1581_v3 = vrot.slane %v1390_v53, %v1110_v4 }
  0xc0   :  { %v872_v27 = vadd.f32 %v871_v13, %v870_v18  ;;  %v998_v10 = vpop.eup %997  ;;  %v875_v39 = vsel %vm36_vm0, %v853_v54, 0.0  ;;  %v629_v31 = vmul.f32 -1.0, %v996_v44 }
  0xc1   :  { %1009 = vpow2.f32 %v658_v22  ;;  %v631_v11 = vmul.f32 -1.0, %v998_v10  ;;  %v877_v15 = vsel %vm36_vm0, %v854_v40, 0.0 }
  0xc2   :  { %v874_v46 = vadd.f32 %v873_v23, %v872_v27  ;;  %v1000_v63 = vpop.eup %999  ;;  %v660_v8 = vmul.f32 1.442695, %v629_v31 }
  0xc3   :  { %v1002_v19 = vpop.eup %1001  ;;  %v855_v57 = vmul.f32 %v1000_v63, %v1581_v3  ;;  %v662_v6 = vmul.f32 1.442695, %v631_v11 }
  0xc4   :  { %v876_v51 = vadd.f32 %v875_v39, %v874_v46  ;;  %v1004_v33 = vpop.eup %1003  ;;  %v856_v0 = vmul.f32 %v1002_v19, %v1582_v36  ;;  %1011 = vpow2.f32 %v660_v8 }
  0xc5   :  { %v879_v59 = vsel %vm36_vm0, %v855_v57, 0.0  ;;  %1013 = vpow2.f32 %v662_v6  ;;  %v633_v20 = vmul.f32 -1.0, %v1004_v33 }
  0xc6   :  { %v878_v1 = vadd.f32 %v877_v15, %v876_v51  ;;  %v1006_v42 = vpop.eup %1005  ;;  %v881_v17 = vsel %vm36_vm0, %v856_v0, 0.0 }
  0xc7   :  { %v857_v53 = vmul.f32 %v1006_v42, %v1402_v24  ;;  %v664_v26 = vmul.f32 1.442695, %v633_v20 }
  0xc8   :  { %v1008_v32 = vpop.eup %1007  ;;  %v880_v7 = vadd.f32 %v879_v59, %v878_v1 }
  0xc9   :  { %v858_v37 = vmul.f32 %v1008_v32, %v1408_v30  ;;  %v883_v25 = vsel %vm36_vm0, %v857_v53, 0.0  ;;  %1015 = vpow2.f32 %v664_v26  ;;  %v1584_v30 = vrot.slane %v1416_v2, %v1110_v4 }
  0xca   :  { %v882_v43 = vadd.f32 %v881_v17, %v880_v7 }
  0xcb   :  { %v885_v14 = vsel %vm36_vm0, %v858_v37, 0.0  ;;  %v1010_v45 = vpop.eup %1009 }
  0xcc   :  { %v884_v50 = vadd.f32 %v883_v25, %v882_v43  ;;  %v859_v62 = vmul.f32 %v1010_v45, %v1583_v9 }
  0xce   :  { %v886_v55 = vadd.f32 %v885_v14, %v884_v50  ;;  %v1012_v38 = vpop.eup %1011  ;;  %v887_v16 = vsel %vm36_vm0, %v859_v62, 0.0 }
  0xcf   :  { %v1014_v24 = vpop.eup %1013  ;;  %v860_v12 = vmul.f32 %v1012_v38, %v1584_v30 }
  0xd0   :  { %v888_v5 = vadd.f32 %v887_v16, %v886_v55  ;;  %v861_v52 = vmul.f32 %v1014_v24, %v1423_v58 }
  0xd1   :  { %v889_v21 = vsel %vm36_vm0, %v860_v12, 0.0 }
  0xd2   :  { %v890_v41 = vadd.f32 %v889_v21, %v888_v5  ;;  %v891_v48 = vsel %vm36_vm0, %v861_v52, 0.0 }
  0xd3   :  { %v1016_v35 = vpop.eup %1015 }
  0xd4   :  { %v892_v49 = vadd.f32 %v891_v48, %v890_v41  ;;  %v862_v60 = vmul.f32 %v1016_v35, %v1429_v61 }
  0xd6   :  { %v893_v47 = vsel %vm36_vm0, %v862_v60, 0.0 }
  0xd7   :  { %v894_v29 = vadd.f32 %v893_v47, %v892_v49 }
  0xd9   :  { %v895_v18 = vadd.f32 %v894_v29, %v666_v56 }
  0xdb   :  { %896 = vst.msk [vmem:[#allocation2] sm:$0xff] %vm36_vm0, %v895_v18 }
  0xe2   :  { %v900_v4 = vld [vmem:[#allocation2] sm:$0xff] }
  0xe3   :  { %v901_v2 = vsel %vm36_vm0, %v900_v4, 0.0 }
  0xe4   :  { %v902_v58 = vrot.slane %v901_v2, 4 }
  0xe6   :  { %v903_v13 = vadd.f32 %v902_v58, %v901_v2 }
  0xe8   :  { %v904_v34 = vrot.slane %v903_v13, 2 }
  0xea   :  { %v905_v28 = vadd.f32 %v904_v34, %v903_v13 }
  0xec   :  { %v906_v23 = vrot.slane %v905_v28, 1 }
  0xee   :  { %v907_v54 = vadd.f32 %v906_v23, %v905_v28 }
  0xf0   :  { %v909_v44 = vmul.f32 0.125, %v907_v54 }
  0xf2   :  { %v910_v27 = vsub.f32 %v900_v4, %v909_v44 }
  0xf4   :  { %v911_v40 = vmul.f32 %v910_v27, %v910_v27 }
  0xf6   :  { %v912_v61 = vsel %vm36_vm0, %v911_v40, 0.0 }
  0xf7   :  { %v913_v22 = vrot.slane %v912_v61, 4 }
  0xf9   :  { %v914_v10 = vadd.f32 %v913_v22, %v912_v61 }
  0xfb   :  { %v915_v39 = vrot.slane %v914_v10, 2 }
  0xfd   :  { %v916_v31 = vadd.f32 %v915_v39, %v914_v10 }
  0xff   :  { %v917_v46 = vrot.slane %v916_v31, 1 }
 0x101   :  { %v918_v11 = vadd.f32 %v917_v46, %v916_v31 }
 0x103   :  { %v919_v63 = vmul.f32 0.125, %v918_v11 }
 0x105   :  { %v920_v15 = vadd.f32 1e-05, %v919_v63 }
 0x107   :  { %1017 = vrsqrt.f32 %v920_v15 }
 0x111   :  { %v1018_v8 = vpop.eup %1017 }
 0x112   :  { %v922_v19 = vmul.f32 %v1018_v8, %v910_v27 }
 0x114   :  { %923 = vst.msk [vmem:[#allocation6] sm:$0xff] %vm36_vm0, %v922_v19 }
 0x115   :  { %1052 = shalt.err (!%p1049_p12)
}
 0x116   :  { %s1053_s16 = scalar_lea.hbm %s1563_s4, 128 }
 0x117   :  { %p1054_p13 = scmp.ne.s32.totalorder %s1563_s4, %s1053_s16  ;;  %p1057_p0 = scmp.lt.u32.totalorder %s1053_s16, %s1563_s4 }
 0x119   :  { %p1059_p1 = pnand %p1057_p0, %p1054_p13 }
 0x11b   :  { %1062 = shalt.err (!%p1059_p1)
}
 0x11c   :  { %933 = dma.vmem_to_hbm [thread:$0]  %s931_s12, 128, %s1563_s4, [#allocation5]  }
 0x11d   :  { %1065 = dma.done.wait [#allocation5], 128  }
 0x11e   :  { %1066 = vsyncadd [#allocation5], 4294967168 }
 0x11f   :  { %937 = vsyncpa [#allocation4], 1 }
 0x120   :  { %938 = vsyncpa [#allocation5], 1 }

</bundles_post_ra>
